<compile_context>
chip_gen: v5e
topology: v5e:2x2
jax: 0.10.0
libtpu: 0.0.40
codegen_flags: <defaults>
</compile_context>

<pallas_src>
import functools

import jax
import jax.numpy as jnp
from jax import lax
from jax.experimental import pallas as pl
from jax.experimental.pallas import tpu as pltpu


def _round_up(a: int, m: int) -> int:
    return (a + m - 1) // m * m


def _infonce_lse_kernel(fq_ref, fk_ref, lse_ref, m_sc, l_sc, *, n_valid, n_pad):
    """Online logsumexp over masked similarity tiles.

    fq_ref: [TQ, D] normalized queries, pre-scaled by 1/temperature.
    fk_ref: [TK, D] normalized keys.
    lse_ref: [TQ, 1] per-row logsumexp over valid (off-diagonal, col < n_valid)
             columns; written on the last column step.
    """
    qi = pl.program_id(0)
    ki = pl.program_id(1)

    @pl.when(ki == 0)
    def _():
        m_sc[...] = jnp.full_like(m_sc, -jnp.inf)
        l_sc[...] = jnp.zeros_like(l_sc)

    # Scaled similarity tile: fq @ fk^T, contraction over D (no transpose
    # materialized).  Precision pinned so the f32 MXU decomposition is the
    # same on every generation.
    sim = lax.dot_general(
        fq_ref[...], fk_ref[...],
        dimension_numbers=(((1,), (1,)), ((), ())),
        precision=lax.Precision.HIGHEST,
        preferred_element_type=jnp.float32)                       # [TQ, TK]
    tq, tk = sim.shape

    def online_update(s):
        m_prev = m_sc[...]
        m_new = jnp.maximum(m_prev, jnp.max(s, axis=1, keepdims=True))
        alpha = jnp.exp(m_prev - m_new)
        l_sc[...] = alpha * l_sc[...] + jnp.sum(jnp.exp(s - m_new), axis=1,
                                                keepdims=True)
        m_sc[...] = m_new

    # The diagonal intersects this tile iff the row/col ranges overlap; padding
    # columns live only in the last column tile (and only if n_pad > 0, which
    # is known statically).  All other (interior) tiles take the unmasked fast
    # path below.
    row0 = qi * tq
    col0 = ki * tk
    needs_mask = (row0 < col0 + tk) & (col0 < row0 + tq)
    if n_pad > 0:
        needs_mask = needs_mask | (ki == pl.num_programs(1) - 1)

    @pl.when(needs_mask)
    def _():
        # -1e30 sentinel is safe: every row sees >= 1 valid column in its first
        # visited column tile (B >= 2), so m stays finite and l stays > 0.
        row_g = row0 + lax.broadcasted_iota(jnp.int32, (tq, tk), 0)
        col_g = col0 + lax.broadcasted_iota(jnp.int32, (tq, tk), 1)
        invalid = (row_g == col_g) | (col_g >= n_valid)
        online_update(jnp.where(invalid, jnp.float32(-1e30), sim))

    @pl.when(jnp.logical_not(needs_mask))
    def _():
        online_update(sim)

    @pl.when(ki == pl.num_programs(1) - 1)
    def _():
        lse_ref[...] = m_sc[...] + jnp.log(l_sc[...])


def infonce_loss(x, y, temperature: float = 0.07):
    """x: [B, D] float features, y: [B] int targets in [0, B-2] (B-1 classes)."""
    B, D = x.shape
    assert B >= 2, "InfoNCE needs at least 2 samples (B-1 negative classes)."

    # --- O(B*D) preprocessing hoisted out of the quadratic kernel loop. ---
    x32 = x.astype(jnp.float32)
    # F.normalize(x, dim=1): x / max(||x||_2, 1e-12).
    norms = jnp.sqrt(jnp.sum(x32 * x32, axis=1, keepdims=True))
    f = x32 / jnp.maximum(norms, jnp.float32(1e-12))
    fq = f * jnp.float32(1.0 / temperature)   # 1/T folded into the LHS operand.

    # Remap targets from the diagonal-removed [B, B-1] column space into the
    # full B-column space: column j' of row i is j' if j' < i else j' + 1.
    idx = jnp.arange(B, dtype=jnp.int32)
    y32 = y.astype(jnp.int32)
    y_full = jnp.where(y32 < idx, y32, y32 + 1)
    # Positive logit extracted here (row gather + rowwise dot), not in the
    # O(B^2) kernel.
    pos = jnp.sum(f * jnp.take(f, y_full, axis=0), axis=1) / jnp.float32(temperature)

    # --- Tiling. ---
    if B <= 128:
        tq = tk = _round_up(B, 8)                 # single tile
    else:
        # TQ=128 keeps >=2 row tiles for v7x megacore sharding; wider TK keeps
        # the reduce lane-dense and amortizes per-step flash-update overhead.
        # VMEM footprint stays tiny: blocks + 2 live [128,512] f32 temporaries
        # are well under every generation's scoped default.
        tq = 128
        tk = min(512, _round_up(B, 128))
    Bp = _round_up(B, max(tq, tk))

    pad = Bp - B
    fq_p = fq if pad == 0 else jnp.pad(fq, ((0, pad), (0, 0)))
    fk_p = f if pad == 0 else jnp.pad(f, ((0, pad), (0, 0)))

    kernel = functools.partial(_infonce_lse_kernel, n_valid=B, n_pad=pad)

    lse = pl.pallas_call(
        kernel,
        out_shape=jax.ShapeDtypeStruct((Bp, 1), jnp.float32),
        grid_spec=pltpu.PrefetchScalarGridSpec(
            num_scalar_prefetch=0,
            grid=(Bp // tq, Bp // tk),
            in_specs=[
                pl.BlockSpec((tq, D), lambda qi, ki: (qi, 0)),   # query rows
                pl.BlockSpec((tk, D), lambda qi, ki: (ki, 0)),   # key rows
            ],
            out_specs=pl.BlockSpec((tq, 1), lambda qi, ki: (qi, 0)),
            scratch_shapes=[
                pltpu.VMEM((tq, 1), jnp.float32),   # running max m
                pltpu.VMEM((tq, 1), jnp.float32),   # running sum l
            ],
        ),
        compiler_params=pltpu.CompilerParams(
            dimension_semantics=("parallel", "arbitrary")),
    )(fq_p, fk_p)

    # Mean reduction over the (unpadded) rows: loss_i = lse_i - pos_i.
    return jnp.mean(lse[:B, 0] - pos)


if __name__ == "__main__":
    key = jax.random.PRNGKey(0)
    B, D = 8, 32
    kx, ky = jax.random.split(key)
    x = jax.random.normal(kx, (B, D), dtype=jnp.float32)
    # CrossEntropyLoss targets over B-1 classes (off-diagonal columns).
    y = jax.random.randint(ky, (B,), 0, B - 1, dtype=jnp.int32)

    loss = infonce_loss(x, y, temperature=0.07)
    jax.block_until_ready(loss)

    # Pure-JAX reference mirroring the PyTorch code path exactly.
    f = x / jnp.maximum(jnp.linalg.norm(x, axis=1, keepdims=True), 1e-12)
    sim = f @ f.T
    offdiag = ~jnp.eye(B, dtype=bool)
    logits = sim[offdiag].reshape(B, B - 1) / 0.07
    lse_ref = jax.nn.logsumexp(logits, axis=1)
    ref = jnp.mean(lse_ref - logits[jnp.arange(B), y])
    assert jnp.allclose(loss, ref, atol=1e-4, rtol=1e-4), (float(loss), float(ref))

    print("KERNEL_OK")
</pallas_src>

<mosaic_0001>
module attributes {stable_mosaic.version = 11 : i64} {
  func.func @_infonce_lse_kernel(%arg0: i32, %arg1: i32, %arg2: memref<8x32xf32, #tpu.memory_space<vmem>>, %arg3: memref<8x32xf32, #tpu.memory_space<vmem>>, %arg4: memref<8x1xf32, #tpu.memory_space<vmem>>, %arg5: memref<8x1xf32, #tpu.memory_space<vmem>>, %arg6: memref<8x1xf32, #tpu.memory_space<vmem>>) attributes {dimension_semantics = [#tpu.dimension_semantics<parallel>, #tpu.dimension_semantics<arbitrary>], iteration_bounds = array<i64: 1, 1>, scalar_prefetch = 0 : i64, scratch_operands = 2 : i64, tpu.core_type = #tpu.core_type<tc>, window_params = [{transform_indices = @transform_0, window_bounds = array<i64: 8, 32>}, {transform_indices = @transform_1, window_bounds = array<i64: 8, 32>}, {transform_indices = @transform_2, window_bounds = array<i64: 8, 1>}]} {
    %c0_i32 = arith.constant 0 : i32
    %0 = arith.cmpi eq, %arg1, %c0_i32 : i32
    %1 = arith.extui %0 : i1 to i32
    %c0_i32_0 = arith.constant 0 : i32
    %2 = arith.cmpi ne, %1, %c0_i32_0 : i32
    scf.if %2 {
      %cst_11 = arith.constant 0xFF800000 : f32
      %21 = vector.broadcast %cst_11 : f32 to vector<8x1xf32>
      %c0_12 = arith.constant 0 : index
      %c0_13 = arith.constant 0 : index
      %22 = vector.load %arg5[%c0_12, %c0_13] : memref<8x1xf32, #tpu.memory_space<vmem>>, vector<8x1xf32>
      tpu.vector_store %arg5[%c0_12, %c0_13], %21 {strides = array<i32>} : memref<8x1xf32, #tpu.memory_space<vmem>>, vector<8x1xf32>,
      %cst_14 = arith.constant 0.000000e+00 : f32
      %23 = vector.broadcast %cst_14 : f32 to vector<8x1xf32>
      %c0_15 = arith.constant 0 : index
      %c0_16 = arith.constant 0 : index
      %24 = vector.load %arg6[%c0_15, %c0_16] : memref<8x1xf32, #tpu.memory_space<vmem>>, vector<8x1xf32>
      tpu.vector_store %arg6[%c0_15, %c0_16], %23 {strides = array<i32>} : memref<8x1xf32, #tpu.memory_space<vmem>>, vector<8x1xf32>,
    } else {
    }
    %c0 = arith.constant 0 : index
    %c0_1 = arith.constant 0 : index
    %3 = vector.load %arg2[%c0, %c0_1] : memref<8x32xf32, #tpu.memory_space<vmem>>, vector<8x32xf32>
    %c0_2 = arith.constant 0 : index
    %c0_3 = arith.constant 0 : index
    %4 = vector.load %arg3[%c0_2, %c0_3] : memref<8x32xf32, #tpu.memory_space<vmem>>, vector<8x32xf32>
    %cst = arith.constant dense<0.000000e+00> : vector<8x8xf32>
    %5 = tpu.matmul %3, %4, %cst {dimension_numbers = #tpu.dot_dimension_numbers<[1], [1], [0], [0], [0, 0, 1, 0], [], []>, precision = #tpu.contract_precision<fp32>} : vector<8x32xf32>, vector<8x32xf32>, vector<8x8xf32> -> vector<8x8xf32>
    %c8_i32 = arith.constant 8 : i32
    %6 = arith.muli %arg0, %c8_i32 : i32
    %c8_i32_4 = arith.constant 8 : i32
    %7 = arith.muli %arg1, %c8_i32_4 : i32
    %c8_i32_5 = arith.constant 8 : i32
    %8 = arith.addi %7, %c8_i32_5 : i32
    %9 = arith.cmpi slt, %6, %8 : i32
    %c8_i32_6 = arith.constant 8 : i32
    %10 = arith.addi %6, %c8_i32_6 : i32
    %11 = arith.cmpi slt, %7, %10 : i32
    %12 = arith.andi %9, %11 : i1
    %13 = arith.extui %12 : i1 to i32
    %c0_i32_7 = arith.constant 0 : i32
    %14 = arith.cmpi ne, %13, %c0_i32_7 : i32
    scf.if %14 {
      %21 = tpu.iota {dimensions = array<i32: 0>} : vector<8x8xi32>
      %22 = vector.broadcast %6 : i32 to vector<8x8xi32>
      %23 = arith.addi %22, %21 : vector<8x8xi32>
      %24 = tpu.iota {dimensions = array<i32: 1>} : vector<8x8xi32>
      %25 = vector.broadcast %7 : i32 to vector<8x8xi32>
      %26 = arith.addi %25, %24 : vector<8x8xi32>
      %27 = arith.cmpi eq, %23, %26 : vector<8x8xi32>
      %c8_i32_11 = arith.constant 8 : i32
      %28 = vector.broadcast %c8_i32_11 : i32 to vector<8x8xi32>
      %29 = arith.cmpi sge, %26, %28 : vector<8x8xi32>
      %30 = arith.ori %27, %29 : vector<8x8xi1>
      %cst_12 = arith.constant -1.000000e+30 : f32
      %31 = vector.broadcast %cst_12 : f32 to vector<8x8xf32>
      %32 = arith.select %30, %31, %5 : vector<8x8xi1>, vector<8x8xf32>
      %c0_13 = arith.constant 0 : index
      %c0_14 = arith.constant 0 : index
      %33 = vector.load %arg5[%c0_13, %c0_14] : memref<8x1xf32, #tpu.memory_space<vmem>>, vector<8x1xf32>
      %cst_15 = arith.constant dense<0xFF800000> : vector<8xf32>
      %34 = vector.multi_reduction <maximumf>, %32, %cst_15 [1] : vector<8x8xf32> to vector<8xf32>
      %35 = vector.shape_cast %34 : vector<8xf32> to vector<8x1xf32>
      %36 = arith.maximumf %33, %35 : vector<8x1xf32>
      %37 = arith.subf %33, %36 : vector<8x1xf32>
      %38 = math.exp %37 : vector<8x1xf32>
      %c0_16 = arith.constant 0 : index
      %c0_17 = arith.constant 0 : index
      %39 = vector.load %arg6[%c0_16, %c0_17] : memref<8x1xf32, #tpu.memory_space<vmem>>, vector<8x1xf32>
      %40 = arith.mulf %38, %39 : vector<8x1xf32>
      %41 = vector.broadcast %36 : vector<8x1xf32> to vector<8x8xf32>
      %42 = arith.subf %32, %41 : vector<8x8xf32>
      %43 = math.exp %42 : vector<8x8xf32>
      %cst_18 = arith.constant dense<0.000000e+00> : vector<8xf32>
      %44 = vector.multi_reduction <add>, %43, %cst_18 [1] : vector<8x8xf32> to vector<8xf32>
      %45 = vector.shape_cast %44 : vector<8xf32> to vector<8x1xf32>
      %46 = arith.addf %40, %45 : vector<8x1xf32>
      %c0_19 = arith.constant 0 : index
      %c0_20 = arith.constant 0 : index
      %47 = vector.load %arg6[%c0_19, %c0_20] : memref<8x1xf32, #tpu.memory_space<vmem>>, vector<8x1xf32>
      tpu.vector_store %arg6[%c0_19, %c0_20], %46 {strides = array<i32>} : memref<8x1xf32, #tpu.memory_space<vmem>>, vector<8x1xf32>,
      %c0_21 = arith.constant 0 : index
      %c0_22 = arith.constant 0 : index
      %48 = vector.load %arg5[%c0_21, %c0_22] : memref<8x1xf32, #tpu.memory_space<vmem>>, vector<8x1xf32>
      tpu.vector_store %arg5[%c0_21, %c0_22], %36 {strides = array<i32>} : memref<8x1xf32, #tpu.memory_space<vmem>>, vector<8x1xf32>,
    } else {
    }
    %true = arith.constant true
    %15 = arith.xori %12, %true : i1
    %16 = arith.extui %15 : i1 to i32
    %c0_i32_8 = arith.constant 0 : i32
    %17 = arith.cmpi ne, %16, %c0_i32_8 : i32
    scf.if %17 {
      %c0_11 = arith.constant 0 : index
      %c0_12 = arith.constant 0 : index
      %21 = vector.load %arg5[%c0_11, %c0_12] : memref<8x1xf32, #tpu.memory_space<vmem>>, vector<8x1xf32>
      %cst_13 = arith.constant dense<0xFF800000> : vector<8xf32>
      %22 = vector.multi_reduction <maximumf>, %5, %cst_13 [1] : vector<8x8xf32> to vector<8xf32>
      %23 = vector.shape_cast %22 : vector<8xf32> to vector<8x1xf32>
      %24 = arith.maximumf %21, %23 : vector<8x1xf32>
      %25 = arith.subf %21, %24 : vector<8x1xf32>
      %26 = math.exp %25 : vector<8x1xf32>
      %c0_14 = arith.constant 0 : index
      %c0_15 = arith.constant 0 : index
      %27 = vector.load %arg6[%c0_14, %c0_15] : memref<8x1xf32, #tpu.memory_space<vmem>>, vector<8x1xf32>
      %28 = arith.mulf %26, %27 : vector<8x1xf32>
      %29 = vector.broadcast %24 : vector<8x1xf32> to vector<8x8xf32>
      %30 = arith.subf %5, %29 : vector<8x8xf32>
      %31 = math.exp %30 : vector<8x8xf32>
      %cst_16 = arith.constant dense<0.000000e+00> : vector<8xf32>
      %32 = vector.multi_reduction <add>, %31, %cst_16 [1] : vector<8x8xf32> to vector<8xf32>
      %33 = vector.shape_cast %32 : vector<8xf32> to vector<8x1xf32>
      %34 = arith.addf %28, %33 : vector<8x1xf32>
      %c0_17 = arith.constant 0 : index
      %c0_18 = arith.constant 0 : index
      %35 = vector.load %arg6[%c0_17, %c0_18] : memref<8x1xf32, #tpu.memory_space<vmem>>, vector<8x1xf32>
      tpu.vector_store %arg6[%c0_17, %c0_18], %34 {strides = array<i32>} : memref<8x1xf32, #tpu.memory_space<vmem>>, vector<8x1xf32>,
      %c0_19 = arith.constant 0 : index
      %c0_20 = arith.constant 0 : index
      %36 = vector.load %arg5[%c0_19, %c0_20] : memref<8x1xf32, #tpu.memory_space<vmem>>, vector<8x1xf32>
      tpu.vector_store %arg5[%c0_19, %c0_20], %24 {strides = array<i32>} : memref<8x1xf32, #tpu.memory_space<vmem>>, vector<8x1xf32>,
    } else {
    }
    %c0_i32_9 = arith.constant 0 : i32
    %18 = arith.cmpi eq, %arg1, %c0_i32_9 : i32
    %19 = arith.extui %18 : i1 to i32
    %c0_i32_10 = arith.constant 0 : i32
    %20 = arith.cmpi ne, %19, %c0_i32_10 : i32
    scf.if %20 {
      %c0_11 = arith.constant 0 : index
      %c0_12 = arith.constant 0 : index
      %21 = vector.load %arg5[%c0_11, %c0_12] : memref<8x1xf32, #tpu.memory_space<vmem>>, vector<8x1xf32>
      %c0_13 = arith.constant 0 : index
      %c0_14 = arith.constant 0 : index
      %22 = vector.load %arg6[%c0_13, %c0_14] : memref<8x1xf32, #tpu.memory_space<vmem>>, vector<8x1xf32>
      %23 = math.log %22 : vector<8x1xf32>
      %24 = arith.addf %21, %23 : vector<8x1xf32>
      %c0_15 = arith.constant 0 : index
      %c0_16 = arith.constant 0 : index
      %25 = vector.load %arg4[%c0_15, %c0_16] : memref<8x1xf32, #tpu.memory_space<vmem>>, vector<8x1xf32>
      tpu.vector_store %arg4[%c0_15, %c0_16], %24 {strides = array<i32>} : memref<8x1xf32, #tpu.memory_space<vmem>>, vector<8x1xf32>,
    } else {
    }
    return
  }
  func.func @transform_0(%arg0: i32, %arg1: i32) -> (i32, i32) {
    %c0_i32 = arith.constant 0 : i32
    %c0_i32_0 = arith.constant 0 : i32
    return %arg0, %c0_i32 : i32, i32
  }
  func.func @transform_1(%arg0: i32, %arg1: i32) -> (i32, i32) {
    %c0_i32 = arith.constant 0 : i32
    %c0_i32_0 = arith.constant 0 : i32
    return %arg1, %c0_i32 : i32, i32
  }
  func.func @transform_2(%arg0: i32, %arg1: i32) -> (i32, i32) {
    %c0_i32 = arith.constant 0 : i32
    %c0_i32_0 = arith.constant 0 : i32
    return %arg0, %c0_i32 : i32, i32
  }
}

</mosaic_0001>

<bundles_post_ra>
// kernel: tpu_custom_call.1
= control target key start
LH: loop header
LB: loop body
LE: loop exit
PB: predicated region body
PF: predicated region fallthrough
CT: control target
= control target key end

     0   :  { %7 = vsyncpa [#allocation5], 0  ;;  %s394_s0 = inlined_call_operand.hbm [shape: f32[8,32], index: 0, kind: input, shape index: {}]   ;;  %s395_s1 = inlined_call_operand.hbm [shape: f32[8,32], index: 1, kind: input, shape index: {}]   ;;  %s396_s2 = inlined_call_operand.vmem [shape: f32[8,1], index: 2, kind: output, shape index: {}]  }
   0x1   :  { %s14_s11 = sshll.u32 %s394_s0, 4  ;;  %s15_s11 = int_to_ptr.hbm [resolvable:$true] %s14_s11 }
   0x2   :  { %8 = vsyncpa [#allocation7], 0  ;;  %s358_s12 = smov [#allocation4]   ;;  %s25_s16 = sshll.u32 %s395_s1, 4  ;;  %s26_s16 = int_to_ptr.hbm [resolvable:$true] %s25_s16 }
   0x3   :  { %s16_s13 = sshll.u32 %s358_s12, 4  ;;  %s359_s17 = smov [#allocation6]   ;;  %s17_s13 = int_to_ptr.vmem [resolvable:$true] %s16_s13 }
   0x4   :  { %19 = dma.hbm_to_vmem [thread:$0]  %s15_s11, 128, %s17_s13, [#allocation5]  }
   0x5   :  { %s27_s18 = sshll.u32 %s359_s17, 4  ;;  %s28_s18 = int_to_ptr.vmem [resolvable:$true] %s27_s18 }
   0x6   :  { %30 = dma.hbm_to_vmem [thread:$0]  %s26_s16, 128, %s28_s18, [#allocation7]  }
   0x7   :  { %354 = dma.done.wait [#allocation5], 128  }
   0x8   :  { %355 = vsyncadd [#allocation5], 4294967168 }
   0x9   :  { %356 = dma.done.wait [#allocation7], 128  }
   0xa   :  { %357 = vsyncadd [#allocation7], 4294967168  ;;  %vm48_vm0 = vcmask 261120   ;;  %v47_v0 = vld [vmem:[#allocation6] sm:$0xff]  ;;  %v46_v1 = vld [vmem:[#allocation4] sm:$0xff]  ;;  %vm43_vm1 = vcmask 7168   ;;  %v211_v16 = vlaneseq }
   0xb   :  { %v53_v2 = vsel %vm48_vm0, %v47_v0, 0  ;;  %v50_v3 = vsel %vm48_vm0, %v46_v1, 0  ;;  %v360_v14 = vmov -inf   ;;  %vm224_vm5 = vcmask 64512  }
   0xc   :  { %v70_v4 = vand.u32 4294901760, %v53_v2  ;;  %v72_v5 = vand.u32 4294901760, %v50_v3  ;;  %44 = vst.msk [vmem:[#allocation2] sm:$0xff] %vm43_vm1, %v360_v14  ;;  %v212_v20 = vshrl.u32 %v211_v16, 7  ;;  %v216_v21 = vand.u32 127, %v211_v16 }
   0xd   :  { %v361_v31 = vmov 0   ;;  %v362_v32 = vmov 0.0  }
   0xe   :  { %v97_v6 = vsub.f32 %v53_v2, %v70_v4  ;;  %71 = vmatpush.xpose.msra.mxu0 %v70_v4  ;;  %147 = vmatpush.xpose.msra.mxu3 %v70_v4  ;;  %v73_v7 = vsub.f32 %v50_v3, %v72_v5  ;;  %vm219_vm2 = vcmp.eq.s32.totalorder %v212_v20, %v216_v21  ;;  %vm220_vm3 = vcmp.ge.s32.totalorder %v216_v21, 8 }
   0xf   :  { %vm221_vm4 = vmor %vm219_vm2, %vm220_vm3  ;;  %299 = vset.pattern.permute.xlu0 %v361_v31  ;;  %45 = vst.msk [vmem:[#allocation3] sm:$0xff] %vm43_vm1, %v362_v32 }
  0x10   :  { %124 = vmatpush.xpose.msra.mxu2 %v97_v6  ;;  %v98_v8 = vand.u32 4294901760, %v97_v6  ;;  %v74_v9 = vand.u32 4294901760, %v73_v7 }
  0x12   :  { %v99_v10 = vsub.f32 %v97_v6, %v98_v8  ;;  %v75_v11 = vsub.f32 %v73_v7, %v74_v9  ;;  %151 = vmatmul.f32.vlgmr.msra.gmra.mxu3 %v74_v9  ;;  %173 = vmatpush.xpose.msrb.mxu0 %v98_v8 }
  0x13   :  { %127 = vmatmul.f32.vlgmr.msra.gmra.mxu2 %v73_v7  ;;  %v223_v33 = vld [vmem:[#allocation2] sm:$0xff] }
  0x14   :  { %v100_v12 = vand.u32 4294901760, %v99_v10  ;;  %v76_v13 = vand.u32 4294901760, %v75_v11 }
  0x16   :  { %101 = vmatpush.xpose.msra.mxu1 %v100_v12  ;;  %77 = vmatmul.f32.vlgmr.msra.gmra.mxu0 %v76_v13  ;;  %v232_v44 = vld [vmem:[#allocation3] sm:$0xff] }
  0x19   :  { %103 = vmatmul.f32.vlgmr.msra.gmra.mxu1 %v72_v5 }
  0x1a   :  { %195 = vmatpush.xpose.msrb.mxu1 %v70_v4 }
  0x1e   :  { %175 = vmatmul.f32.vlgmr.msrb.gmra.mxu0 %v72_v5 }
  0x21   :  { %197 = vmatmul.f32.vlgmr.msrb.gmra.mxu1 %v72_v5 }
  0x93   :  { %v78_v15 = vpop.f32.mrf.mxu0 }
  0x95   :  { %v152_v22 = vpop.f32.mrf.mxu3 }
  0x96   :  { %v104_v17 = vpop.f32.mrf.mxu1  ;;  %v128_v18 = vpop.f32.mrf.mxu2 }
  0x97   :  { %v105_v19 = vadd.f32 %v104_v17, %v78_v15 }
  0x99   :  { %v129_v23 = vadd.f32 %v128_v18, %v105_v19 }
  0x9b   :  { %v153_v24 = vadd.f32 %v152_v22, %v129_v23  ;;  %v176_v25 = vpop.f32.mrf.mxu0 }
  0x9d   :  { %v177_v26 = vadd.f32 %v176_v25, %v153_v24 }
  0x9e   :  { %v198_v27 = vpop.f32.mrf.mxu1 }
  0x9f   :  { %v199_v28 = vadd.f32 %v198_v27, %v177_v26 }
  0xa1   :  { %v222_v29 = vsel %vm221_vm4, -1e+30, %v199_v28 }
  0xa2   :  { %v225_v30 = vsel %vm224_vm5, %v222_v29, -inf }
  0xa3   :  { %226 = vmax.xlane.f32.xlu0 %v225_v30 }
 0x116   :  { %v227_v34 = vpop.xlane.xlu0 %226 }
 0x117   :  { %v228_v35 = vmax.f32 %v223_v33, %v227_v34 }
 0x119   :  { %v229_v36 = vsub.f32 %v223_v33, %v228_v35  ;;  %248 = vst.msk [vmem:[#allocation2] sm:$0xff] %vm43_vm1, %v228_v35  ;;  %236 = vperm.xlu0 %299, %v228_v35  }
 0x11b   :  { %v230_v42 = vmul.f32 1.442695, %v229_v36 }
 0x120   :  { %v281_v51 = vld [vmem:[#allocation2] sm:$0xff] }
 0x18b   :  { %v237_v37 = vpop.permute.xlu0 %236 }
 0x18c   :  { %v239_v38 = vsub.f32 %v222_v29, %v237_v37 }
 0x18e   :  { %v240_v39 = vmul.f32 1.442695, %v239_v38 }
 0x190   :  { %300 = vpow2.f32 %v240_v39 }
 0x191   :  { %302 = vpow2.f32 %v230_v42 }
 0x196   :  { %v301_v40 = vpop.eup %300 }
 0x197   :  { %v242_v41 = vsel %vm224_vm5, %v301_v40, 0.0  ;;  %v303_v43 = vpop.eup %302 }
 0x198   :  { %243 = vadd.xlane.f32.xlu1 %v242_v41  ;;  %v233_v45 = vmul.f32 %v303_v43, %v232_v44 }
 0x20b   :  { %v244_v46 = vpop.xlane.xlu1 %243 }
 0x20c   :  { %v245_v47 = vadd.f32 %v244_v46, %v233_v45 }
 0x20e   :  { %247 = vst.msk [vmem:[#allocation3] sm:$0xff] %vm43_vm1, %v245_v47 }
 0x215   :  { %v282_v48 = vld [vmem:[#allocation3] sm:$0xff] }
 0x216   :  { %304 = vlog2.f32 %v282_v48 }
 0x21c   :  { %v305_v49 = vpop.eup %304 }
 0x21d   :  { %v284_v50 = vmul.f32 0.6931472, %v305_v49 }
 0x21f   :  { %v285_v52 = vadd.f32 %v284_v50, %v281_v51 }
 0x221   :  { %287 = vst.msk [vmem:[%s396_s2] sm:$0xff] %vm43_vm1, %v285_v52 }
 0x222   :  { %292 = vsyncpa [#allocation5], 1 }
 0x223   :  { %293 = vsyncpa [#allocation7], 1 }

</bundles_post_ra>
